<compile_context>
chip_gen: v7x
topology: tpu7x:2x2x1
jax: 0.10.0
libtpu: 0.0.40
codegen_flags: <defaults>
</compile_context>

<pallas_src>
import functools

import jax
import jax.numpy as jnp
from jax import lax
from jax.experimental import pallas as pl
from jax.experimental.pallas import tpu as pltpu


# ----------------------------------------------------------------------------
# Fused kernel: one (batch, patch-pixel) slab per grid step.
#   qkv conv1x1 -> softmax over N -> context vector -> relu(v)*cv -> out_proj
# ----------------------------------------------------------------------------
def _linear_self_attn_kernel(x_ref, w_kv_ref, b_kv_ref, w_q_ref, w_out_ref,
                             b_out_ref, o_ref, *, embed_dim):
    C = embed_dim

    x = x_ref[...]                                        # (C, N) f32 slab
    x_bf = x.astype(jnp.bfloat16)                         # bf16 MXU operand

    # Fused key/value 1x1 conv: (2C, C) @ (C, N), bf16 operands, f32 accumulate.
    # Rows are ordered [key(C), value(C)] so both slices are sublane-aligned.
    kv = jnp.dot(w_kv_ref[...], x_bf,
                 preferred_element_type=jnp.float32) + b_kv_ref[...]
    key = kv[0:C, :]                                      # (C, N)
    val = kv[C:2 * C, :]                                  # (C, N)

    # Query as its own 1-row dot (keeps the kv matmul at exactly M=128 rows
    # for the v5e MXU).  b_query is dropped: a constant added before the
    # softmax over N cancels exactly.
    q = jnp.dot(w_q_ref[...], x_bf,
                preferred_element_type=jnp.float32)       # (1, N)

    # Softmax over the N (num patches) axis, f32.
    m = jnp.max(q, axis=-1, keepdims=True)
    e = jnp.exp(q - m)
    denom = jnp.sum(e, axis=-1, keepdims=True)
    scores = e * pl.reciprocal(denom, approx=True)        # (1, N)

    # Context vector + relu(value) gating, fed straight into out_proj
    # (no VMEM scratch round-trip).
    cv = jnp.sum(key * scores, axis=-1, keepdims=True)    # (C, 1)
    ctx = jnp.maximum(val, 0.0) * cv                      # (C, N)

    # out_proj 1x1 conv on this slab: (C, C) @ (C, N).
    y = jnp.dot(w_out_ref[...], ctx.astype(jnp.bfloat16),
                preferred_element_type=jnp.float32) + b_out_ref[...]
    o_ref[...] = y.astype(o_ref.dtype)


# ----------------------------------------------------------------------------
# Wrapper: same layout / semantics as the PyTorch module ((B, C, P, N) f32).
# ----------------------------------------------------------------------------
def linear_self_attention(x, params):
    B, C, P, N = x.shape
    assert C % 8 == 0 and N % 128 == 0, (C, N)
    L = P * N

    # Merge trailing (P, N) -> L outside the kernel (free reshape); the grid
    # tiles columns back into per-patch-pixel (C, N) slabs.
    x2d = x.reshape(B, C, L)

    # Pack key/value weights as [key, value] rows; cast matmul operands to
    # bf16 once here.  Biases stay f32 (added post-accumulation).
    w_kv = jnp.concatenate(
        [params["w_key"], params["w_value"]], axis=0).astype(jnp.bfloat16)    # (2C, C)
    b_kv = jnp.concatenate(
        [params["b_key"], params["b_value"]], axis=0).reshape(2 * C, 1)       # (2C, 1) f32
    w_q = params["w_query"].astype(jnp.bfloat16)                              # (1, C)
    w_out = params["w_out"].astype(jnp.bfloat16)                              # (C, C)
    b_out = params["b_out"].reshape(C, 1)                                     # (C, 1) f32

    kernel = functools.partial(_linear_self_attn_kernel, embed_dim=C)

    out2d = pl.pallas_call(
        kernel,
        out_shape=jax.ShapeDtypeStruct((B, C, L), jnp.float32),
        grid=(B, P),
        in_specs=[
            pl.BlockSpec((None, C, N), lambda b, p: (b, 0, p)),   # x slab
            pl.BlockSpec((2 * C, C), lambda b, p: (0, 0)),        # kv weight
            pl.BlockSpec((2 * C, 1), lambda b, p: (0, 0)),        # kv bias
            pl.BlockSpec((1, C), lambda b, p: (0, 0)),            # query weight
            pl.BlockSpec((C, C), lambda b, p: (0, 0)),            # out_proj weight
            pl.BlockSpec((C, 1), lambda b, p: (0, 0)),            # out_proj bias
        ],
        out_specs=pl.BlockSpec((None, C, N), lambda b, p: (b, 0, p)),
        compiler_params=pltpu.CompilerParams(
            dimension_semantics=("parallel", "parallel"),
            vmem_limit_bytes=32 * 1024 * 1024),
    )(x2d, w_kv, b_kv, w_q, w_out, b_out)

    return out2d.reshape(B, C, P, N)


# ----------------------------------------------------------------------------
# Pure-JAX reference (mirrors the PyTorch forward, full f32) for correctness.
# ----------------------------------------------------------------------------
def linear_self_attention_reference(x, params):
    C = x.shape[1]
    hi = lax.Precision.HIGHEST
    q = jnp.einsum("oc,bcpn->bopn", params["w_query"], x, precision=hi) \
        + params["b_query"].reshape(1, 1, 1, 1)
    k = jnp.einsum("oc,bcpn->bopn", params["w_key"], x, precision=hi) \
        + params["b_key"].reshape(1, C, 1, 1)
    v = jnp.einsum("oc,bcpn->bopn", params["w_value"], x, precision=hi) \
        + params["b_value"].reshape(1, C, 1, 1)
    scores = jax.nn.softmax(q, axis=-1)                        # (B, 1, P, N)
    cv = jnp.sum(k * scores, axis=-1, keepdims=True)           # (B, C, P, 1)
    out = jax.nn.relu(v) * cv                                  # (B, C, P, N)
    y = jnp.einsum("oc,bcpn->bopn", params["w_out"], out, precision=hi) \
        + params["b_out"].reshape(1, C, 1, 1)
    return y


# ----------------------------------------------------------------------------
# Deterministic synthetic parameters (qkv_proj / out_proj 1x1 convs with bias).
# ----------------------------------------------------------------------------
def make_params(key, embed_dim):
    ks = jax.random.split(key, 8)
    s = 0.1
    return {
        "w_query": s * jax.random.normal(ks[0], (1, embed_dim), jnp.float32),
        "w_key":   s * jax.random.normal(ks[1], (embed_dim, embed_dim), jnp.float32),
        "w_value": s * jax.random.normal(ks[2], (embed_dim, embed_dim), jnp.float32),
        "b_query": 0.02 * jax.random.normal(ks[3], (1,), jnp.float32),
        "b_key":   0.02 * jax.random.normal(ks[4], (embed_dim,), jnp.float32),
        "b_value": 0.02 * jax.random.normal(ks[5], (embed_dim,), jnp.float32),
        "w_out":   s * jax.random.normal(ks[6], (embed_dim, embed_dim), jnp.float32),
        "b_out":   0.02 * jax.random.normal(ks[7], (embed_dim,), jnp.float32),
    }


if __name__ == "__main__":
    # Small shapes consistent with the module: (B, C, P, N) where C = embed_dim,
    # P = pixels per patch (2x2 -> 4), N = number of patches.
    B, C, P, N = 2, 64, 4, 256

    key = jax.random.PRNGKey(0)
    kx, kp = jax.random.split(key)
    x = jax.random.normal(kx, (B, C, P, N), jnp.float32)
    params = make_params(kp, C)

    out = jax.jit(linear_self_attention)(x, params)
    out = jax.block_until_ready(out)

    assert out.shape == (B, C, P, N), out.shape
    assert bool(jnp.all(jnp.isfinite(out)))

    # Numerical check vs. the f32 HIGHEST-precision reference.  Expected error
    # is dominated by the bf16 matmul operands (~2^-9 relative per operand,
    # f32 accumulation) plus the approx EUP reciprocal in the softmax; the
    # observed normalized max error is O(1e-3..1e-2), so 3e-2 is a safe bound.
    ref = linear_self_attention_reference(x, params)
    err = float(jnp.max(jnp.abs(out - ref)) / (jnp.max(jnp.abs(ref)) + 1e-6))
    assert err < 3e-2, f"mismatch vs reference: normalized max err {err}"

    print("KERNEL_OK")
</pallas_src>

<mosaic_0001>
module attributes {stable_mosaic.version = 11 : i64} {
  func.func @_linear_self_attn_kernel(%arg0: i32, %arg1: i32, %arg2: memref<1x64x256xf32, #tpu.memory_space<vmem>>, %arg3: memref<128x64xbf16, #tpu.memory_space<vmem>>, %arg4: memref<128x1xf32, #tpu.memory_space<vmem>>, %arg5: memref<1x64xbf16, #tpu.memory_space<vmem>>, %arg6: memref<64x64xbf16, #tpu.memory_space<vmem>>, %arg7: memref<64x1xf32, #tpu.memory_space<vmem>>, %arg8: memref<1x64x256xf32, #tpu.memory_space<vmem>>) attributes {dimension_semantics = [#tpu.dimension_semantics<parallel>, #tpu.dimension_semantics<parallel>], iteration_bounds = array<i64: 2, 4>, scalar_prefetch = 0 : i64, scratch_operands = 0 : i64, tpu.core_type = #tpu.core_type<tc>, window_params = [{transform_indices = @transform_0, window_bounds = array<i64: 1, 64, 256>}, {pipeline_mode = #tpu.pipeline_mode<synchronous>, transform_indices = @transform_1, window_bounds = array<i64: 128, 64>}, {pipeline_mode = #tpu.pipeline_mode<synchronous>, transform_indices = @transform_2, window_bounds = array<i64: 128, 1>}, {pipeline_mode = #tpu.pipeline_mode<synchronous>, transform_indices = @transform_3, window_bounds = array<i64: 1, 64>}, {pipeline_mode = #tpu.pipeline_mode<synchronous>, transform_indices = @transform_4, window_bounds = array<i64: 64, 64>}, {pipeline_mode = #tpu.pipeline_mode<synchronous>, transform_indices = @transform_5, window_bounds = array<i64: 64, 1>}, {transform_indices = @transform_6, window_bounds = array<i64: 1, 64, 256>}]} {
    %c0 = arith.constant 0 : index
    %c0_0 = arith.constant 0 : index
    %c0_1 = arith.constant 0 : index
    %0 = vector.load %arg2[%c0, %c0_0, %c0_1] : memref<1x64x256xf32, #tpu.memory_space<vmem>>, vector<1x64x256xf32>
    %1 = vector.shape_cast %0 : vector<1x64x256xf32> to vector<64x256xf32>
    %2 = arith.truncf %1 : vector<64x256xf32> to vector<64x256xbf16>
    %c0_2 = arith.constant 0 : index
    %c0_3 = arith.constant 0 : index
    %3 = vector.load %arg3[%c0_2, %c0_3] : memref<128x64xbf16, #tpu.memory_space<vmem>>, vector<128x64xbf16>
    %cst = arith.constant dense<0.000000e+00> : vector<128x256xf32>
    %4 = tpu.matmul %3, %2, %cst {dimension_numbers = #tpu.dot_dimension_numbers<[1], [0], [0], [1], [0, 0, 1, 1], [], []>} : vector<128x64xbf16>, vector<64x256xbf16>, vector<128x256xf32> -> vector<128x256xf32>
    %c0_4 = arith.constant 0 : index
    %c0_5 = arith.constant 0 : index
    %5 = vector.load %arg4[%c0_4, %c0_5] : memref<128x1xf32, #tpu.memory_space<vmem>>, vector<128x1xf32>
    %6 = vector.broadcast %5 : vector<128x1xf32> to vector<128x256xf32>
    %7 = arith.addf %4, %6 : vector<128x256xf32>
    %8 = vector.extract_strided_slice %7 {offsets = [0, 0], sizes = [64, 256], strides = [1, 1]} : vector<128x256xf32> to vector<64x256xf32>
    %9 = vector.extract_strided_slice %7 {offsets = [64, 0], sizes = [64, 256], strides = [1, 1]} : vector<128x256xf32> to vector<64x256xf32>
    %c0_6 = arith.constant 0 : index
    %c0_7 = arith.constant 0 : index
    %10 = vector.load %arg5[%c0_6, %c0_7] : memref<1x64xbf16, #tpu.memory_space<vmem>>, vector<1x64xbf16>
    %cst_8 = arith.constant dense<0.000000e+00> : vector<1x256xf32>
    %11 = tpu.matmul %10, %2, %cst_8 {dimension_numbers = #tpu.dot_dimension_numbers<[1], [0], [0], [1], [0, 0, 1, 1], [], []>} : vector<1x64xbf16>, vector<64x256xbf16>, vector<1x256xf32> -> vector<1x256xf32>
    %cst_9 = arith.constant dense<0xFF800000> : vector<1xf32>
    %12 = vector.multi_reduction <maximumf>, %11, %cst_9 [1] : vector<1x256xf32> to vector<1xf32>
    %13 = vector.shape_cast %12 : vector<1xf32> to vector<1x1xf32>
    %14 = vector.broadcast %13 : vector<1x1xf32> to vector<1x256xf32>
    %15 = arith.subf %11, %14 : vector<1x256xf32>
    %16 = math.exp %15 : vector<1x256xf32>
    %cst_10 = arith.constant dense<0.000000e+00> : vector<1xf32>
    %17 = vector.multi_reduction <add>, %16, %cst_10 [1] : vector<1x256xf32> to vector<1xf32>
    %18 = vector.shape_cast %17 : vector<1xf32> to vector<1x1xf32>
    %19 = tpu.reciprocal %18 {approx = true} : vector<1x1xf32> -> vector<1x1xf32>
    %20 = vector.broadcast %19 : vector<1x1xf32> to vector<1x256xf32>
    %21 = arith.mulf %16, %20 : vector<1x256xf32>
    %22 = vector.broadcast %21 : vector<1x256xf32> to vector<64x256xf32>
    %23 = arith.mulf %8, %22 : vector<64x256xf32>
    %cst_11 = arith.constant dense<0.000000e+00> : vector<64xf32>
    %24 = vector.multi_reduction <add>, %23, %cst_11 [1] : vector<64x256xf32> to vector<64xf32>
    %25 = vector.shape_cast %24 : vector<64xf32> to vector<64x1xf32>
    %cst_12 = arith.constant 0.000000e+00 : f32
    %26 = vector.broadcast %cst_12 : f32 to vector<64x256xf32>
    %27 = arith.maximumf %9, %26 : vector<64x256xf32>
    %28 = vector.broadcast %25 : vector<64x1xf32> to vector<64x256xf32>
    %29 = arith.mulf %27, %28 : vector<64x256xf32>
    %c0_13 = arith.constant 0 : index
    %c0_14 = arith.constant 0 : index
    %30 = vector.load %arg6[%c0_13, %c0_14] : memref<64x64xbf16, #tpu.memory_space<vmem>>, vector<64x64xbf16>
    %31 = arith.truncf %29 : vector<64x256xf32> to vector<64x256xbf16>
    %cst_15 = arith.constant dense<0.000000e+00> : vector<64x256xf32>
    %32 = tpu.matmul %30, %31, %cst_15 {dimension_numbers = #tpu.dot_dimension_numbers<[1], [0], [0], [1], [0, 0, 1, 1], [], []>} : vector<64x64xbf16>, vector<64x256xbf16>, vector<64x256xf32> -> vector<64x256xf32>
    %c0_16 = arith.constant 0 : index
    %c0_17 = arith.constant 0 : index
    %33 = vector.load %arg7[%c0_16, %c0_17] : memref<64x1xf32, #tpu.memory_space<vmem>>, vector<64x1xf32>
    %34 = vector.broadcast %33 : vector<64x1xf32> to vector<64x256xf32>
    %35 = arith.addf %32, %34 : vector<64x256xf32>
    %c0_18 = arith.constant 0 : index
    %c0_19 = arith.constant 0 : index
    %c0_20 = arith.constant 0 : index
    %36 = vector.load %arg8[%c0_18, %c0_19, %c0_20] : memref<1x64x256xf32, #tpu.memory_space<vmem>>, vector<1x64x256xf32>
    %37 = vector.shape_cast %36 : vector<1x64x256xf32> to vector<64x256xf32>
    %38 = vector.shape_cast %35 : vector<64x256xf32> to vector<1x64x256xf32>
    tpu.vector_store %arg8[%c0_18, %c0_19, %c0_20], %38 {strides = array<i32>} : memref<1x64x256xf32, #tpu.memory_space<vmem>>, vector<1x64x256xf32>,
    return
  }
  func.func @transform_0(%arg0: i32, %arg1: i32) -> (i32, i32, i32) {
    %c0_i32 = arith.constant 0 : i32
    %c0_i32_0 = arith.constant 0 : i32
    return %arg0, %c0_i32, %arg1 : i32, i32, i32
  }
  func.func @transform_1(%arg0: i32, %arg1: i32) -> (i32, i32) {
    %c0_i32 = arith.constant 0 : i32
    %c0_i32_0 = arith.constant 0 : i32
    %c0_i32_1 = arith.constant 0 : i32
    return %c0_i32, %c0_i32_0 : i32, i32
  }
  func.func @transform_2(%arg0: i32, %arg1: i32) -> (i32, i32) {
    %c0_i32 = arith.constant 0 : i32
    %c0_i32_0 = arith.constant 0 : i32
    %c0_i32_1 = arith.constant 0 : i32
    return %c0_i32, %c0_i32_0 : i32, i32
  }
  func.func @transform_3(%arg0: i32, %arg1: i32) -> (i32, i32) {
    %c0_i32 = arith.constant 0 : i32
    %c0_i32_0 = arith.constant 0 : i32
    %c0_i32_1 = arith.constant 0 : i32
    return %c0_i32, %c0_i32_0 : i32, i32
  }
  func.func @transform_4(%arg0: i32, %arg1: i32) -> (i32, i32) {
    %c0_i32 = arith.constant 0 : i32
    %c0_i32_0 = arith.constant 0 : i32
    %c0_i32_1 = arith.constant 0 : i32
    return %c0_i32, %c0_i32_0 : i32, i32
  }
  func.func @transform_5(%arg0: i32, %arg1: i32) -> (i32, i32) {
    %c0_i32 = arith.constant 0 : i32
    %c0_i32_0 = arith.constant 0 : i32
    %c0_i32_1 = arith.constant 0 : i32
    return %c0_i32, %c0_i32_0 : i32, i32
  }
  func.func @transform_6(%arg0: i32, %arg1: i32) -> (i32, i32, i32) {
    %c0_i32 = arith.constant 0 : i32
    %c0_i32_0 = arith.constant 0 : i32
    return %arg0, %c0_i32, %arg1 : i32, i32, i32
  }
}

</mosaic_0001>

<bundles_post_ra>
// kernel: linear_self_attention.1
= control target key start
LH: loop header
LB: loop body
LE: loop exit
PB: predicated region body
PF: predicated region fallthrough
CT: control target
= control target key end

     0   :  { %s1305_s21 = smov 0   ;;  %s1307_s22 = smov 0   ;;  %s1666_s0 = inlined_call_operand.vmem [shape: f32[2,64,1024], index: 0, kind: input, shape index: {}]   ;;  %s1667_s1 = inlined_call_operand.vmem [shape: bf16[128,64], index: 1, kind: input, shape index: {}]   ;;  %s1668_s2 = inlined_call_operand.vmem [shape: f32[128,1], index: 2, kind: input, shape index: {}]   ;;  %s1669_s3 = inlined_call_operand.vmem [shape: bf16[1,64], index: 3, kind: input, shape index: {}]   ;;  %s1670_s4 = inlined_call_operand.vmem [shape: bf16[64,64], index: 4, kind: input, shape index: {}]   ;;  %s1671_s5 = inlined_call_operand.vmem [shape: f32[64,1], index: 5, kind: input, shape index: {}]   ;;  %s1672_s6 = inlined_call_operand.vmem [shape: f32[2,64,1024], index: 6, kind: output, shape index: {}]  }
   0x1   :  { %s1309_s23 = smov 0   ;;  %s1311_s24 = smov 0  }
   0x2   :  { %s1313_s25 = smov 0   ;;  %s1315_s26 = smov 0  }
   0x3   :  { %s1317_s27 = smov 0  }
   0x4 LB: > { %s25_s28 = sadd.s32 1, %s1259_s25  ;;  %s28_s29 = sadd.s32 1, %s1263_s26  ;;  %s1267_s27 = sphi %s1317_s27, %s16_s27   ;;  %s1263_s26 = sphi %s1315_s26, %s1679_s26   ;;  %s1259_s25 = sphi %s1313_s25, %s1678_s25   ;;  %s1255_s24 = sphi %s1311_s24, %s1677_s24   ;;  %s1251_s23 = sphi %s1309_s23, %s1676_s23   ;;  %s1247_s22 = sphi %s1307_s22, %s1675_s22   ;;  %s1243_s21 = sphi %s1305_s21, %s1674_s21  }
   0x5   : > { %p26_p0 = scmp.ge.s32.totalorder %s25_s28, 4  ;;  %s1094_s30 = sadd.s32 4294967295, %s1267_s27  }
   0x6   : > { %p44_p1 = scmp.ne.s32.totalorder %s1247_s22, %s1243_s21  ;;  %p45_p2 = scmp.eq.s32.totalorder %s1267_s27, 0 }
   0x7   : > { %s1681_s28 = smov (%p26_p0, %s25_s28), 0  ;;  %s1683_s29 = smov (!%p26_p0, %s28_s29), %s1263_s26 }
   0x8   : > { %p30_p3 = scmp.ge.s32.totalorder %s1683_s29, 2  ;;  %p181_p4 = scmp.eq.s32.totalorder %s1094_s30, 7 }
   0x9   : > { %s33_s7 = ssub.s32 %s1259_s25, %s1681_s28  ;;  %p46_p5 = por %p45_p2, %p44_p1 }
   0xa   : > { %s1685_s29 = smov (%p30_p3, %s1683_s29), 0  ;;  %p1353_p6 = por %p181_p4, %p44_p1 }
   0xb   : > { %s32_s9 = ssub.s32 %s1263_s26, %s1685_s29  ;;  %s37_s11 = sadd.s32 1, %s1247_s22 }
   0xc   : > { %s34_s10 = sor.u32 %s33_s7, %s32_s9  ;;  %p1097_p8 = scmp.ge.s32.totalorder %s1267_s27, 8 }
   0xd   : > { %p35_p7 = scmp.eq.s32.totalorder %s34_s10, 0 }
   0xe   : > { %218 = sbr.rel (%p1097_p8) target bundleno = 36 (0x24), region = 36 }
   0xf   : > { %s1361_s12 = scalar_select %p35_p7, %s1247_s22, %s37_s11  }
  0x15   : > { %221 = sbr.rel (!%p46_p5) target bundleno = 36 (0x24), region = 40  ;;  %s223_s13 = sand.u32 (%p46_p5), 1, %s1247_s22  }
  0x16   : > { %s1099_s14 = sshll.u32 (%p46_p5), %s1259_s25, 1  ;;  %s1098_s15 = sshll.u32 (%p46_p5), %s223_s13, 7 }
  0x17   : > { %s1100_s16 = sshll.u32 (%p46_p5), %s1263_s26, 6  ;;  %s225_s7 = scalar_lea.vmem (%p46_p5), [#allocation2], %s1098_s15 }
  0x18   : > { %s228_s17 = sadd.s32 (%p46_p5), %s1100_s16, %s1099_s14 }
  0x19   : > { %s1101_s18 = sshll.u32 (%p46_p5), %s228_s17, 3 }
  0x1a   : > { %s1370_s30 = scalar_lea.vmem (%p46_p5), %s1666_s0, %s1101_s18 }
  0x1b   : > { %v243_v0 = vld [vmem:[%s1370_s30] sm:$0xff] (%p46_p5)  ;;  %v245_v1 = vld [vmem:[%s1370_s30 + $0x8] sm:$0xff] (%p46_p5) }
  0x1c   : > { %v247_v2 = vld [vmem:[%s1370_s30 + $0x40] sm:$0xff]  ;;  %244 = vst [vmem:[%s225_s7] sm:$0xff] %v243_v0  ;;  %246 = vst [vmem:[%s225_s7 + $0x8] sm:$0xff] %v245_v1  ;;  %v249_v3 = vld [vmem:[%s1370_s30 + $0x48] sm:$0xff] }
  0x1d   : > { %248 = vst [vmem:[%s225_s7 + $0x10] sm:$0xff] %v247_v2  ;;  %v251_v4 = vld [vmem:[%s1370_s30 + $0x80] sm:$0xff]  ;;  %v253_v5 = vld [vmem:[%s1370_s30 + $0x88] sm:$0xff]  ;;  %250 = vst [vmem:[%s225_s7 + $0x18] sm:$0xff] %v249_v3 }
  0x1e   : > { %252 = vst [vmem:[%s225_s7 + $0x20] sm:$0xff] %v251_v4  ;;  %254 = vst [vmem:[%s225_s7 + $0x28] sm:$0xff] %v253_v5  ;;  %v255_v6 = vld [vmem:[%s1370_s30 + $0xc0] sm:$0xff]  ;;  %v257_v7 = vld [vmem:[%s1370_s30 + $0xc8] sm:$0xff] }
  0x1f   : > { %v259_v8 = vld [vmem:[%s1370_s30 + $0x100] sm:$0xff]  ;;  %256 = vst [vmem:[%s225_s7 + $0x30] sm:$0xff] %v255_v6  ;;  %258 = vst [vmem:[%s225_s7 + $0x38] sm:$0xff] %v257_v7  ;;  %v261_v9 = vld [vmem:[%s1370_s30 + $0x108] sm:$0xff] }
  0x20   : > { %260 = vst [vmem:[%s225_s7 + $0x40] sm:$0xff] %v259_v8  ;;  %v263_v10 = vld [vmem:[%s1370_s30 + $0x140] sm:$0xff]  ;;  %v265_v11 = vld [vmem:[%s1370_s30 + $0x148] sm:$0xff]  ;;  %262 = vst [vmem:[%s225_s7 + $0x48] sm:$0xff] %v261_v9 }
  0x21   : > { %264 = vst [vmem:[%s225_s7 + $0x50] sm:$0xff] %v263_v10  ;;  %266 = vst [vmem:[%s225_s7 + $0x58] sm:$0xff] %v265_v11  ;;  %v267_v12 = vld [vmem:[%s1370_s30 + $0x180] sm:$0xff]  ;;  %v269_v13 = vld [vmem:[%s1370_s30 + $0x188] sm:$0xff] }
  0x22   : > { %v271_v14 = vld [vmem:[%s1370_s30 + $0x1c0] sm:$0xff]  ;;  %268 = vst [vmem:[%s225_s7 + $0x60] sm:$0xff] %v267_v12  ;;  %270 = vst [vmem:[%s225_s7 + $0x68] sm:$0xff] %v269_v13  ;;  %v273_v15 = vld [vmem:[%s1370_s30 + $0x1c8] sm:$0xff] }
  0x23   : > { %272 = vst [vmem:[%s225_s7 + $0x70] sm:$0xff] %v271_v14  ;;  %274 = vst [vmem:[%s225_s7 + $0x78] sm:$0xff] %v273_v15 }
  0x24 PF: > { %p1102_p9 = scmp.ge.s32.totalorder %s1267_s27, 1  ;;  %p279_p10 = scmp.lt.s32.totalorder %s1267_s27, 9 }
  0x26   : > { %p280_p11 = pnand %p1102_p9, %p279_p10 }
  0x27   : > { %s286_s9 = sand.u32 (!%p280_p11), 1, %s1243_s21   ;;  %v1269_v16 = vmov (!%p280_p11), 0   ;;  %vm493_vm0 = vcmask (!%p280_p11), 523264   ;;  %v631_v41 = vld [vmem:[%s1669_s3] sm:$0x1] (!%p280_p11)  ;;  %v1196_v44 = vld [vmem:[%s1667_s1 + $0x8] sm:$0xff] (!%p280_p11)  }
  0x28   : > { %283 = sbr.rel (%p280_p11) target bundleno = 1027 (0x403), region = 63  ;;  %s1391_s10 = sshll.u32 (!%p280_p11), %s286_s9, 7  ;;  %667 = vmatprep.mubr.bf16.mxu1 (!%p280_p11), %v1269_v16  ;;  %550 = vmatprep.mubr.bf16.mxu0 (!%p280_p11), %v1269_v16  ;;  %v1195_v42 = vld [vmem:[%s1667_s1] sm:$0xff] (!%p280_p11)   ;;  %v1197_v45 = vld [vmem:[%s1667_s1 + $0x10] sm:$0xff] (!%p280_p11)   ;;  %v1198_v46 = vld [vmem:[%s1667_s1 + $0x18] sm:$0xff] (!%p280_p11)   ;;  %vm676_vm1 = vcmask (!%p280_p11), 1040384  }
  0x29   : > { %1193 = vset.pattern.permute.xlu1 (!%p280_p11), %v1269_v16  ;;  %1194 = vset.pattern.permute.xlu0 (!%p280_p11), %v1269_v16  ;;  %s288_s11 = scalar_lea.vmem (!%p280_p11), [#allocation2], %s1391_s10  ;;  %v357_v43 = vld [vmem:[%s1668_s2] sm:$0xff] (!%p280_p11)  ;;  %v1200_v48 = vld [vmem:[%s1667_s1 + $0x28] sm:$0xff] (!%p280_p11)   ;;  %v1201_v49 = vld [vmem:[%s1667_s1 + $0x30] sm:$0xff] (!%p280_p11)   ;;  %s1604_s30 = scalar_lea.vmem (!%p280_p11), [#allocation3], %s1391_s10 }
  0x2a   : > { %v318_v17 = vld [vmem:[%s288_s11 + $0x8] sm:$0xff] (!%p280_p11)  ;;  %v320_v18 = vld [vmem:[%s288_s11 + $0x18] sm:$0xff] (!%p280_p11)  ;;  %v317_v19 = vld [vmem:[%s288_s11] sm:$0xff] (!%p280_p11)  ;;  %375 = vperm.xlu1 (!%p280_p11), %1193, %v357_v43  }
  0x2b   : > { %v334_v20 = vpack.c.bf16 (!%p280_p11), %v320_v18, %v318_v17  ;;  %v319_v21 = vld [vmem:[%s288_s11 + $0x10] sm:$0xff] (!%p280_p11)  ;;  %v322_v22 = vld [vmem:[%s288_s11 + $0x28] sm:$0xff] (!%p280_p11)  ;;  %v324_v23 = vld [vmem:[%s288_s11 + $0x38] sm:$0xff] (!%p280_p11) }
  0x2c   : > { %v333_v24 = vpack.c.bf16 (!%p280_p11), %v319_v21, %v317_v19  ;;  %v336_v25 = vpack.c.bf16 (!%p280_p11), %v324_v23, %v322_v22  ;;  %v321_v26 = vld [vmem:[%s288_s11 + $0x20] sm:$0xff] (!%p280_p11)  ;;  %v323_v27 = vld [vmem:[%s288_s11 + $0x30] sm:$0xff] (!%p280_p11)  ;;  %v326_v28 = vld [vmem:[%s288_s11 + $0x48] sm:$0xff] (!%p280_p11) }
  0x2d   : > { %635 = vmatprep.subr.bf16.mxu1 (!%p280_p11), %v334_v20  ;;  %v328_v29 = vld [vmem:[%s288_s11 + $0x58] sm:$0xff] (!%p280_p11)  ;;  %518 = vmatprep.subr.bf16.mxu0 (!%p280_p11), %v334_v20  ;;  %v335_v30 = vpack.c.bf16 (!%p280_p11), %v323_v27, %v321_v26  ;;  %v325_v31 = vld [vmem:[%s288_s11 + $0x40] sm:$0xff] (!%p280_p11)  ;;  %v327_v32 = vld [vmem:[%s288_s11 + $0x50] sm:$0xff] (!%p280_p11) }
  0x2e   : > { %636 = vmatpush1.bf16.msra.mxu1 (!%p280_p11), %v333_v24  ;;  %v330_v33 = vld [vmem:[%s288_s11 + $0x68] sm:$0xff] (!%p280_p11)  ;;  %519 = vmatpush1.bf16.msra.mxu0 (!%p280_p11), %v333_v24  ;;  %v338_v34 = vpack.c.bf16 (!%p280_p11), %v328_v29, %v326_v28  ;;  %v332_v35 = vld [vmem:[%s288_s11 + $0x78] sm:$0xff] (!%p280_p11)  ;;  %v329_v36 = vld [vmem:[%s288_s11 + $0x60] sm:$0xff] (!%p280_p11)  ;;  %v337_v38 = vpack.c.bf16 (!%p280_p11), %v327_v32, %v325_v31 }
  0x2f   : > { %637 = vmatprep.subr.bf16.mxu1 %v336_v25  ;;  %520 = vmatprep.subr.bf16.mxu0 %v336_v25  ;;  %v331_v37 = vld [vmem:[%s288_s11 + $0x70] sm:$0xff]  ;;  %v340_v39 = vpack.c.bf16 %v332_v35, %v330_v33  ;;  %v1199_v47 = vld [vmem:[%s1667_s1 + $0x20] sm:$0xff]   ;;  %v358_v57 = vld [vmem:[%s1668_s2 + $0x8] sm:$0xff]  ;;  %s1131_s10 = sshll.u32 (%p1353_p6), %s1251_s23, 1  ;;  %s1132_s7 = sshll.u32 (%p1353_p6), %s1255_s24, 6 }
  0x30   : > { %v339_v40 = vpack.c.bf16 %v331_v37, %v329_v36  ;;  %380 = vperm.xlu1 %1193, %v358_v57   ;;  %v360_v58 = vld [vmem:[%s1668_s2 + $0x18] sm:$0xff]  ;;  %v361_v59 = vld [vmem:[%s1668_s2 + $0x20] sm:$0xff]  ;;  %v362_v60 = vld [vmem:[%s1668_s2 + $0x28] sm:$0xff]  ;;  %s970_s8 = sadd.s32 (%p1353_p6), %s1132_s7, %s1131_s10 }
  0x31   : > { %v363_v61 = vld [vmem:[%s1668_s2 + $0x30] sm:$0xff]  ;;  %v364_v62 = vld [vmem:[%s1668_s2 + $0x38] sm:$0xff]  ;;  %v365_v63 = vld [vmem:[%s1668_s2 + $0x40] sm:$0xff]  ;;  %s1133_s9 = sshll.u32 (%p1353_p6), %s970_s8, 3 }
  0x32   : > { %638 = vmatpush1.bf16.msra.mxu1 %v335_v30  ;;  %521 = vmatpush1.bf16.msra.mxu0 %v335_v30  ;;  %v366_v0 = vld [vmem:[%s1668_s2 + $0x48] sm:$0xff]  ;;  %v369_v1 = vld [vmem:[%s1668_s2 + $0x60] sm:$0xff]  ;;  %v1202_v3 = vld [vmem:[%s1667_s1 + $0x38] sm:$0xff]   ;;  %s972_s13 = scalar_lea.vmem (%p1353_p6), %s1672_s6, %s1133_s9 }
  0x33   : > { %639 = vmatprep.subr.bf16.mxu1 %v338_v34  ;;  %522 = vmatprep.subr.bf16.mxu0 %v338_v34  ;;  %v370_v2 = vld [vmem:[%s1668_s2 + $0x68] sm:$0xff]  ;;  %v359_v43 = vld [vmem:[%s1668_s2 + $0x10] sm:$0xff] }
  0x34   : > { %390 = vperm.xlu1 %1193, %v360_v58  }
  0x36   : > { %640 = vmatpush1.bf16.msra.mxu1 %v337_v38  ;;  %523 = vmatpush1.bf16.msra.mxu0 %v337_v38 }
  0x37   : > { %641 = vmatprep.subr.bf16.mxu1 %v340_v39  ;;  %524 = vmatprep.subr.bf16.mxu0 %v340_v39 }
  0x38   : > { %395 = vperm.xlu1 %1193, %v361_v59  }
  0x3a   : > { %642 = vmatpush1.bf16.msra.mxu1 %v339_v40  ;;  %525 = vmatpush1.bf16.msra.mxu0 %v339_v40 }
  0x3c   : > { %400 = vperm.xlu1 %1193, %v362_v60  }
  0x3d   : > { %1121 = vmatmul.mubr.msk.bf16.vlgmr.msra.gmra.mrb[0].mxu1 %vm493_vm0, %v631_v41  ;;  %1113 = vmatmul.mubr.msk.bf16.vlgmr.msra.gmra.mrb[0].mxu0 %vm493_vm0, %v1195_v42 }
  0x3e   : > { %904 = vmatprep.mubr.bf16.mxu1 %v1269_v16  ;;  %560 = vmatprep.mubr.bf16.mxu0 %v1269_v16 }
  0x40   : > { %405 = vperm.xlu1 %1193, %v363_v61  }
  0x44   : > { %410 = vperm.xlu1 %1193, %v364_v62  }
  0x45   : > { %1114 = vmatmul.mubr.msk.bf16.gmra.mrb[4].mxu0 %vm493_vm0, %v1196_v44  ;;  %v367_v44 = vld [vmem:[%s1668_s2 + $0x50] sm:$0xff] }
  0x46   : > { %570 = vmatprep.mubr.bf16.mxu0 %v1269_v16 }
  0x48   : > { %415 = vperm.xlu1 %1193, %v365_v63  }
  0x4c   : > { %420 = vperm.xlu1 %1193, %v366_v0  }
  0x4d   : > { %1115 = vmatmul.mubr.msk.bf16.gmra.mrb[8].mxu0 %vm493_vm0, %v1197_v45  ;;  %v368_v45 = vld [vmem:[%s1668_s2 + $0x58] sm:$0xff] }
  0x4e   : > { %580 = vmatprep.mubr.bf16.mxu0 %v1269_v16 }
  0x50   : > { %435 = vperm.xlu1 %1193, %v369_v1  }
  0x54   : > { %440 = vperm.xlu1 %1193, %v370_v2  }
  0x55   : > { %1116 = vmatmul.mubr.msk.bf16.gmra.mrb[12].mxu0 %vm493_vm0, %v1198_v46 }
  0x56   : > { %590 = vmatprep.mubr.bf16.mxu0 %v1269_v16 }
  0x5d   : > { %1117 = vmatmul.mubr.msk.bf16.gmra.mrb[16].mxu0 %vm493_vm0, %v1199_v47 }
  0x5e   : > { %600 = vmatprep.mubr.bf16.mxu0 %v1269_v16 }
  0x65   : > { %1118 = vmatmul.mubr.msk.bf16.gmra.mrb[20].mxu0 %vm493_vm0, %v1200_v48 }
  0x66   : > { %610 = vmatprep.mubr.bf16.mxu0 %v1269_v16 }
  0x6d   : > { %1119 = vmatmul.mubr.msk.bf16.gmra.mrb[24].mxu0 %vm493_vm0, %v1201_v49 }
  0x6e   : > { %620 = vmatprep.mubr.bf16.mxu0 %v1269_v16 }
  0x75   : > { %1120 = vmatmul.mubr.msk.bf16.gmra.mrb[28].mxu0 %vm493_vm0, %v1202_v3 }
  0xa9   : > { %v376_v46 = vpop.permute.xlu1 %375 }
  0xaf   : > { %v381_v47 = vpop.permute.xlu1 %380 }
  0xb3   : > { %v391_v48 = vpop.permute.xlu1 %390 }
  0xb7   : > { %v396_v49 = vpop.permute.xlu1 %395 }
 0x110   : > { %v669_v50 = vpop.f32.mrb[0].mxu1  ;;  %v552_v4 = vpop.f32.mrb[0].mxu0 }
 0x111   : > { %v671_v51 = vpop.f32.mrb[1].mxu1  ;;  %v677_v52 = vsel %vm676_vm1, %v669_v50, -inf  ;;  %v554_v5 = vpop.f32.mrb[1].mxu0 }
 0x112   : > { %v673_v53 = vpop.f32.mrb[2].mxu1  ;;  %v678_v54 = vsel %vm676_vm1, %v671_v51, -inf  ;;  %v556_v6 = vpop.f32.mrb[2].mxu0  ;;  %v555_v57 = vadd.f32 %v554_v5, %v376_v46 }
 0x113   : > { %v674_v55 = vpop.f32.mrb[3].mxu1  ;;  %v679_v56 = vmax.f32 %v677_v52, %v678_v54  ;;  %v558_v7 = vpop.f32.mrb[3].mxu0  ;;  %v557_v62 = vadd.f32 %v556_v6, %v381_v47 }
 0x114   : > { %v401_v52 = vpop.permute.xlu1 %400  ;;  %v559_v63 = vadd.f32 %v558_v7, %v381_v47 }
 0x115   : > { %680 = vmax.xlane.f32.xlu0 %v679_v56  ;;  %v553_v56 = vadd.f32 %v552_v4, %v376_v46 }
 0x118   : > { %v1477_v8 = vpop.f32.mrb[4].mxu0  ;;  %v406_v58 = vpop.permute.xlu1 %405 }
 0x119   : > { %v1479_v9 = vpop.f32.mrb[5].mxu0 }
 0x11a   : > { %v566_v10 = vpop.f32.mrb[6].mxu0 }
 0x11b   : > { %v568_v11 = vpop.f32.mrb[7].mxu0  ;;  %v567_v0 = vadd.f32 %v566_v10, %v391_v48 }
 0x11c   : > { %v569_v1 = vadd.f32 %v568_v11, %v391_v48  ;;  %v411_v11 = vpop.permute.xlu1 %410 }
 0x120   : > { %v572_v12 = vpop.f32.mrb[8].mxu0 }
 0x121   : > { %v574_v13 = vpop.f32.mrb[9].mxu0  ;;  %v573_v2 = vadd.f32 %v572_v12, %v396_v49 }
 0x122   : > { %v576_v14 = vpop.f32.mrb[10].mxu0  ;;  %v575_v3 = vadd.f32 %v574_v13, %v396_v49 }
 0x123   : > { %v578_v15 = vpop.f32.mrb[11].mxu0 }
 0x128   : > { %v1481_v17 = vpop.f32.mrb[12].mxu0 }
 0x129   : > { %v1483_v18 = vpop.f32.mrb[13].mxu0 }
 0x12a   : > { %v1485_v19 = vpop.f32.mrb[14].mxu0  ;;  %v585_v6 = vadd.f32 %v1483_v18, %v406_v58 }
 0x12b   : > { %v1487_v20 = vpop.f32.mrb[15].mxu0 }
 0x130   : > { %v1489_v21 = vpop.f32.mrb[16].mxu0 }
 0x131   : > { %v1491_v22 = vpop.f32.mrb[17].mxu0 }
 0x132   : > { %v1493_v23 = vpop.f32.mrb[18].mxu0 }
 0x133   : > { %v1495_v24 = vpop.f32.mrb[19].mxu0 }
 0x138   : > { %v1497_v25 = vpop.f32.mrb[20].mxu0 }
 0x139   : > { %v1499_v26 = vpop.f32.mrb[21].mxu0 }
 0x13a   : > { %v1503_v37 = vpop.f32.mrb[22].mxu0 }
 0x13b   : > { %v1505_v38 = vpop.f32.mrb[23].mxu0 }
 0x140   : > { %v1507_v39 = vpop.f32.mrb[24].mxu0 }
 0x141   : > { %v1509_v40 = vpop.f32.mrb[25].mxu0 }
 0x142   : > { %v1511_v41 = vpop.f32.mrb[26].mxu0 }
 0x143   : > { %v1513_v42 = vpop.f32.mrb[27].mxu0 }
 0x1a2   : > { %v681_v27 = vpop.xlane.xlu0 %680 }
 0x1a3   : > { %v682_v28 = vsub.f32 %v669_v50, %v681_v27  ;;  %v683_v29 = vsub.f32 %v671_v51, %v681_v27  ;;  %v696_v51 = vlaneseq }
 0x1a5   : > { %v684_v30 = vmul.f32 1.442695, %v682_v28  ;;  %v686_v31 = vmul.f32 1.442695, %v683_v29  ;;  %v697_v53 = vshrl.u32 %v696_v51, 7  ;;  %v577_v29 = vadd.f32 %v576_v14, %v401_v52 }
 0x1a7   : > { %1207 = vpow2.f32 %v684_v30  ;;  %v698_v54 = vsub.s32 0, %v697_v53  ;;  %v579_v30 = vadd.f32 %v578_v15, %v401_v52  ;;  %v587_v15 = vadd.f32 %v1485_v19, %v411_v11  ;;  %v1533_v53 = vpop.f32.mrb[28].mxu0 }
 0x1a8   : > { %1209 = vpow2.f32 %v686_v31 }
 0x1b1   : > { %v1208_v32 = vpop.eup %1207 }
 0x1b2   : > { %v1210_v33 = vpop.eup %1209  ;;  %v688_v34 = vsel %vm676_vm1, %v1208_v32, 0.0 }
 0x1b3   : > { %v689_v35 = vsel %vm676_vm1, %v1210_v33, 0.0 }
 0x1b4   : > { %v690_v36 = vadd.f32 %v689_v35, %v688_v34 }
 0x1b6   : > { %691 = vadd.xlane.f32.xlu0 %v690_v36 }
 0x1cc   : > { %385 = vperm.xlu0 %1194, %v359_v43  }
 0x1d0   : > { %425 = vperm.xlu0 %1194, %v367_v44  }
 0x1d4   : > { %430 = vperm.xlu0 %1194, %v368_v45  }
 0x243   : > { %v692_v50 = vpop.xlane.xlu0 %691 }
 0x244   : > { %1211 = vrcp.f32 %v692_v50 }
 0x24b   : > { %v386_v61 = vpop.permute.xlu0 %385 }
 0x24c   : > { %v563_v31 = vadd.f32 %v1477_v8, %v386_v61  ;;  %v565_v34 = vadd.f32 %v1479_v9, %v386_v61  ;;  %v589_v8 = vadd.f32 %v1487_v20, %v411_v11  ;;  %v795_v20 = vld [vmem:[%s1671_s5 + $0x18] sm:$0xff]  ;;  %v794_v61 = vld [vmem:[%s1671_s5 + $0x10] sm:$0xff] }
 0x24e   : > { %v1212_v55 = vpop.eup %1211 }
 0x24f   : > { %v694_v59 = vmul.f32 %v1212_v55, %v1208_v32  ;;  %v695_v60 = vmul.f32 %v1212_v55, %v1210_v33  ;;  %v583_v33 = vadd.f32 %v1481_v17, %v406_v58  ;;  %v371_v55 = vld [vmem:[%s1668_s2 + $0x70] sm:$0xff] }
 0x251   : > { %v699_v27 = vrot.slane %v694_v59, %v698_v54  ;;  %v703_v28 = vrot.slane %v695_v60, %v698_v54  ;;  %v1535_v54 = vpop.f32.mrb[29].mxu0  ;;  %v792_v59 = vld [vmem:[%s1671_s5] sm:$0xff]  ;;  %v793_v60 = vld [vmem:[%s1671_s5 + $0x8] sm:$0xff] }
 0x253   : > { %v706_v4 = vmul.f32 %v699_v27, %v557_v62  ;;  %v707_v5 = vmul.f32 %v703_v28, %v559_v63  ;;  %v704_v35 = vmul.f32 %v699_v27, %v553_v56  ;;  %v705_v32 = vmul.f32 %v703_v28, %v555_v57  ;;  %v1540_v56 = vpop.f32.mrb[30].mxu0  ;;  %v372_v57 = vld [vmem:[%s1668_s2 + $0x78] sm:$0xff]  ;;  %v796_v62 = vld [vmem:[%s1671_s5 + $0x20] sm:$0xff]  ;;  %v797_v63 = vld [vmem:[%s1671_s5 + $0x28] sm:$0xff] }
 0x254   : > { %v708_v7 = vmul.f32 %v699_v27, %v563_v31  ;;  %v709_v10 = vmul.f32 %v703_v28, %v565_v34  ;;  %v710_v36 = vmul.f32 %v699_v27, %v567_v0  ;;  %v711_v14 = vmul.f32 %v703_v28, %v569_v1  ;;  %v1545_v58 = vpop.f32.mrb[31].mxu0  ;;  %v798_v0 = vld [vmem:[%s1671_s5 + $0x30] sm:$0xff]  ;;  %v799_v1 = vld [vmem:[%s1671_s5 + $0x38] sm:$0xff] }
 0x255   : > { %v723_v12 = vadd.f32 %v707_v5, %v706_v4  ;;  %v720_v13 = vadd.f32 %v705_v32, %v704_v35  ;;  %v712_v43 = vmul.f32 %v699_v27, %v573_v2  ;;  %v713_v45 = vmul.f32 %v703_v28, %v575_v3  ;;  %v416_v2 = vpop.permute.xlu1 %415 }
 0x256   : > { %v726_v9 = vadd.f32 %v709_v10, %v708_v7  ;;  %v729_v44 = vadd.f32 %v711_v14, %v710_v36  ;;  %v714_v17 = vmul.f32 %v699_v27, %v577_v29  ;;  %v715_v46 = vmul.f32 %v703_v28, %v579_v30 }
 0x257   : > { %724 = vadd.xlane.f32.xlu0 %v723_v12  ;;  %721 = vadd.xlane.f32.xlu1 %v720_v13  ;;  %v716_v18 = vmul.f32 %v699_v27, %v583_v33  ;;  %v717_v47 = vmul.f32 %v703_v28, %v585_v6  ;;  %v718_v48 = vmul.f32 %v699_v27, %v587_v15 }
 0x258   : > { %v732_v49 = vadd.f32 %v713_v45, %v712_v43  ;;  %v719_v50 = vmul.f32 %v703_v28, %v589_v8  ;;  %v735_v51 = vadd.f32 %v715_v46, %v714_v17  ;;  %v426_v28 = vpop.permute.xlu0 %425  ;;  %v593_v29 = vadd.f32 %v1489_v21, %v416_v2 }
 0x259   : > { %v738_v52 = vadd.f32 %v717_v47, %v716_v18  ;;  %v421_v3 = vpop.permute.xlu1 %420  ;;  %v595_v30 = vadd.f32 %v1491_v22, %v416_v2  ;;  %v603_v33 = vadd.f32 %v1497_v25, %v426_v28  ;;  %v605_v6 = vadd.f32 %v1499_v26, %v426_v28 }
 0x25a   : > { %v741_v19 = vadd.f32 %v719_v50, %v718_v48  ;;  %v597_v31 = vadd.f32 %v1493_v23, %v421_v3  ;;  %v599_v34 = vadd.f32 %v1495_v24, %v421_v3  ;;  %v744_v35 = vmax.f32 %v593_v29, 0.0 }
 0x25b   : > { %727 = vadd.xlane.f32.xlu0 %v726_v9  ;;  %730 = vadd.xlane.f32.xlu1 %v729_v44  ;;  %v745_v32 = vmax.f32 %v595_v30, 0.0  ;;  %v748_v8 = vmax.f32 %v603_v33, 0.0  ;;  %v749_v9 = vmax.f32 %v605_v6, 0.0 }
 0x25c   : > { %v431_v5 = vpop.permute.xlu0 %430  ;;  %v746_v7 = vmax.f32 %v597_v31, 0.0  ;;  %v747_v10 = vmax.f32 %v599_v34, 0.0 }
 0x25d   : > { %v436_v27 = vpop.permute.xlu1 %435  ;;  %v607_v11 = vadd.f32 %v1503_v37, %v431_v5  ;;  %v609_v21 = vadd.f32 %v1505_v38, %v431_v5 }
 0x25e   : > { %v613_v22 = vadd.f32 %v1507_v39, %v436_v27  ;;  %v615_v23 = vadd.f32 %v1509_v40, %v436_v27 }
 0x25f   : > { %733 = vadd.xlane.f32.xlu0 %v732_v49  ;;  %736 = vadd.xlane.f32.xlu1 %v735_v51  ;;  %v750_v43 = vmax.f32 %v607_v11, 0.0  ;;  %v751_v37 = vmax.f32 %v609_v21, 0.0 }
 0x260   : > { %v752_v47 = vmax.f32 %v613_v22, 0.0  ;;  %v753_v48 = vmax.f32 %v615_v23, 0.0 }
 0x261   : > { %v441_v4 = vpop.permute.xlu1 %440 }
 0x262   : > { %v617_v25 = vadd.f32 %v1511_v41, %v441_v4  ;;  %v619_v26 = vadd.f32 %v1513_v42, %v441_v4 }
 0x263   : > { %739 = vadd.xlane.f32.xlu0 %v738_v52  ;;  %742 = vadd.xlane.f32.xlu1 %v741_v19 }
 0x264   : > { %v754_v49 = vmax.f32 %v617_v25, 0.0  ;;  %v755_v41 = vmax.f32 %v619_v26, 0.0 }
 0x274   : > { %817 = vperm.xlu1 %1193, %v795_v20  }
 0x279   : > { %445 = vperm.xlu0 %1194, %v371_v55  }
 0x27d   : > { %450 = vperm.xlu0 %1194, %v372_v57  }
 0x281   : > { %802 = vperm.xlu0 %1194, %v792_v59  }
 0x285   : > { %807 = vperm.xlu0 %1194, %v793_v60  }
 0x289   : > { %812 = vperm.xlu0 %1194, %v794_v61  }
 0x28d   : > { %822 = vperm.xlu0 %1194, %v796_v62  }
 0x291   : > { %827 = vperm.xlu0 %1194, %v797_v63  }
 0x295   : > { %832 = vperm.xlu0 %1194, %v798_v0  }
 0x299   : > { %837 = vperm.xlu0 %1194, %v799_v1  }
 0x2e4   : > { %v725_v12 = vpop.xlane.xlu0 %724  ;;  %v722_v24 = vpop.xlane.xlu1 %721 }
 0x2e5   : > { %v762_v13 = vmul.f32 %v746_v7, %v725_v12  ;;  %v763_v36 = vmul.f32 %v747_v10, %v725_v12  ;;  %v760_v14 = vmul.f32 %v744_v35, %v722_v24  ;;  %v761_v15 = vmul.f32 %v745_v32, %v722_v24 }
 0x2e7   : > { %v784_v44 = vpack.c.bf16 %v762_v13, %v760_v14  ;;  %v785_v38 = vpack.c.bf16 %v763_v36, %v761_v15 }
 0x2e8   : > { %v728_v45 = vpop.xlane.xlu0 %727  ;;  %v731_v39 = vpop.xlane.xlu1 %730 }
 0x2e9   : > { %v764_v17 = vmul.f32 %v748_v8, %v728_v45  ;;  %v765_v40 = vmul.f32 %v749_v9, %v728_v45  ;;  %v766_v46 = vmul.f32 %v750_v43, %v731_v39  ;;  %v767_v18 = vmul.f32 %v751_v37, %v731_v39  ;;  %872 = vmatprep.subr.bf16.mxu1 %v785_v38 }
 0x2ea   : > { %873 = vmatpush1.bf16.msra.mxu1 %v784_v44 }
 0x2eb   : > { %v786_v50 = vpack.c.bf16 %v766_v46, %v764_v17  ;;  %v787_v42 = vpack.c.bf16 %v767_v18, %v765_v40 }
 0x2ec   : > { %v734_v51 = vpop.xlane.xlu0 %733  ;;  %v737_v52 = vpop.xlane.xlu1 %736 }
 0x2ed   : > { %v768_v19 = vmul.f32 %v752_v47, %v734_v51  ;;  %v769_v20 = vmul.f32 %v753_v48, %v734_v51  ;;  %v770_v55 = vmul.f32 %v754_v49, %v737_v52  ;;  %v771_v57 = vmul.f32 %v755_v41, %v737_v52  ;;  %874 = vmatprep.subr.bf16.mxu1 %v787_v42 }
 0x2ee   : > { %875 = vmatpush1.bf16.msra.mxu1 %v786_v50 }
 0x2ef   : > { %v788_v59 = vpack.c.bf16 %v770_v55, %v768_v19  ;;  %v789_v60 = vpack.c.bf16 %v771_v57, %v769_v20 }
 0x2f0   : > { %v740_v61 = vpop.xlane.xlu0 %739  ;;  %v743_v31 = vpop.xlane.xlu1 %742 }
 0x2f1   : > { %876 = vmatprep.subr.bf16.mxu1 %v789_v60 }
 0x2f2   : > { %877 = vmatpush1.bf16.msra.mxu1 %v788_v59 }
 0x2f4   : > { %v818_v26 = vpop.permute.xlu1 %817 }
 0x2f8   : > { %v446_v62 = vpop.permute.xlu0 %445 }
 0x2f9   : > { %v623_v63 = vadd.f32 %v1533_v53, %v446_v62  ;;  %v625_v0 = vadd.f32 %v1535_v54, %v446_v62  ;;  %v1203_v53 = vld [vmem:[%s1670_s4] sm:$0xff]   ;;  %v1204_v54 = vld [vmem:[%s1670_s4 + $0x8] sm:$0xff]  }
 0x2fb   : > { %v756_v2 = vmax.f32 %v623_v63, 0.0  ;;  %v757_v3 = vmax.f32 %v625_v0, 0.0 }
 0x2fc   : > { %v451_v1 = vpop.permute.xlu0 %450 }
 0x2fd   : > { %v627_v27 = vadd.f32 %v1540_v56, %v451_v1  ;;  %v629_v28 = vadd.f32 %v1545_v58, %v451_v1  ;;  %v772_v34 = vmul.f32 %v756_v2, %v740_v61  ;;  %v773_v4 = vmul.f32 %v757_v3, %v740_v61  ;;  %v1205_v56 = vld [vmem:[%s1670_s4 + $0x10] sm:$0xff]   ;;  %v1206_v58 = vld [vmem:[%s1670_s4 + $0x18] sm:$0xff]  }
 0x2ff   : > { %v758_v29 = vmax.f32 %v627_v27, 0.0  ;;  %v759_v30 = vmax.f32 %v629_v28, 0.0 }
 0x300   : > { %v803_v6 = vpop.permute.xlu0 %802 }
 0x301   : > { %v774_v5 = vmul.f32 %v758_v29, %v743_v31  ;;  %v775_v35 = vmul.f32 %v759_v30, %v743_v31 }
 0x303   : > { %v790_v32 = vpack.c.bf16 %v774_v5, %v772_v34  ;;  %v791_v33 = vpack.c.bf16 %v775_v35, %v773_v4 }
 0x304   : > { %v808_v7 = vpop.permute.xlu0 %807 }
 0x305   : > { %878 = vmatprep.subr.bf16.mxu1 %v791_v33 }
 0x306   : > { %879 = vmatpush1.bf16.msra.mxu1 %v790_v32 }
 0x308   : > { %v813_v22 = vpop.permute.xlu0 %812 }
 0x309   : > { %1126 = vmatmul.mubr.msk.bf16.vlgmr.msra.gmra.mrb[4].mxu1 %vm493_vm0, %v1203_v53 }
 0x30a   : > { %914 = vmatprep.mubr.bf16.mxu1 %v1269_v16 }
 0x30c   : > { %v823_v36 = vpop.permute.xlu0 %822 }
 0x310   : > { %v828_v38 = vpop.permute.xlu0 %827 }
 0x311   : > { %1127 = vmatmul.mubr.msk.bf16.gmra.mrb[8].mxu1 %vm493_vm0, %v1204_v54 }
 0x312   : > { %924 = vmatprep.mubr.bf16.mxu1 %v1269_v16 }
 0x314   : > { %v833_v48 = vpop.permute.xlu0 %832 }
 0x318   : > { %v838_v51 = vpop.permute.xlu0 %837 }
 0x319   : > { %1128 = vmatmul.mubr.msk.bf16.gmra.mrb[12].mxu1 %vm493_vm0, %v1205_v56 }
 0x31a   : > { %934 = vmatprep.mubr.bf16.mxu1 %v1269_v16 }
 0x321   : > { %1129 = vmatmul.mubr.msk.bf16.gmra.mrb[16].mxu1 %vm493_vm0, %v1206_v58 }
 0x3dc   : > { %v906_v10 = vpop.f32.mrb[4].mxu1 }
 0x3dd   : > { %v907_v11 = vadd.f32 %v906_v10, %v803_v6  ;;  %v908_v21 = vpop.f32.mrb[5].mxu1 }
 0x3de   : > { %v909_v23 = vadd.f32 %v908_v21, %v803_v6  ;;  %v910_v12 = vpop.f32.mrb[6].mxu1 }
 0x3df   : > { %945 = vst [vmem:[%s1604_s30] sm:$0xff] %v907_v11  ;;  %v911_v16 = vadd.f32 %v910_v12, %v808_v7  ;;  %v912_v24 = vpop.f32.mrb[7].mxu1 }
 0x3e0   : > { %946 = vst [vmem:[%s1604_s30 + $0x8] sm:$0xff] %v909_v23  ;;  %v913_v13 = vadd.f32 %v912_v24, %v808_v7 }
 0x3e1   : > { %947 = vst [vmem:[%s1604_s30 + $0x10] sm:$0xff] %v911_v16 }
 0x3e2   : > { %948 = vst [vmem:[%s1604_s30 + $0x18] sm:$0xff] %v913_v13 }
 0x3e4   : > { %v916_v14 = vpop.f32.mrb[8].mxu1 }
 0x3e5   : > { %v917_v15 = vadd.f32 %v916_v14, %v813_v22  ;;  %v918_v25 = vpop.f32.mrb[9].mxu1 }
 0x3e6   : > { %v919_v8 = vadd.f32 %v918_v25, %v813_v22  ;;  %v920_v9 = vpop.f32.mrb[10].mxu1  ;;  %v985_v59 = vld [vmem:[%s1604_s30] sm:$0xff] (%p1353_p6) }
 0x3e7   : > { %949 = vst [vmem:[%s1604_s30 + $0x20] sm:$0xff] %v917_v15  ;;  %v921_v43 = vadd.f32 %v920_v9, %v818_v26  ;;  %v922_v37 = vpop.f32.mrb[11].mxu1  ;;  %v987_v60 = vld [vmem:[%s1604_s30 + $0x8] sm:$0xff] (%p1353_p6)  ;;  %986 = vst [vmem:[%s972_s13] sm:$0xff] (%p1353_p6), %v985_v59 }
 0x3e8   : > { %950 = vst [vmem:[%s1604_s30 + $0x28] sm:$0xff] %v919_v8  ;;  %v923_v44 = vadd.f32 %v922_v37, %v818_v26  ;;  %v989_v61 = vld [vmem:[%s1604_s30 + $0x10] sm:$0xff] (%p1353_p6)  ;;  %988 = vst [vmem:[%s972_s13 + $0x8] sm:$0xff] (%p1353_p6), %v987_v60 }
 0x3e9   : > { %951 = vst [vmem:[%s1604_s30 + $0x30] sm:$0xff] %v921_v43  ;;  %v991_v62 = vld [vmem:[%s1604_s30 + $0x18] sm:$0xff] (%p1353_p6)  ;;  %990 = vst [vmem:[%s972_s13 + $0x40] sm:$0xff] (%p1353_p6), %v989_v61 }
 0x3ea   : > { %952 = vst [vmem:[%s1604_s30 + $0x38] sm:$0xff] %v923_v44  ;;  %992 = vst [vmem:[%s972_s13 + $0x48] sm:$0xff] (%p1353_p6), %v991_v62 }
 0x3ec   : > { %v926_v45 = vpop.f32.mrb[12].mxu1 }
 0x3ed   : > { %v927_v39 = vadd.f32 %v926_v45, %v823_v36  ;;  %v928_v17 = vpop.f32.mrb[13].mxu1 }
 0x3ee   : > { %v929_v40 = vadd.f32 %v928_v17, %v823_v36  ;;  %v930_v46 = vpop.f32.mrb[14].mxu1  ;;  %v993_v63 = vld [vmem:[%s1604_s30 + $0x20] sm:$0xff] (%p1353_p6) }
 0x3ef   : > { %953 = vst [vmem:[%s1604_s30 + $0x40] sm:$0xff] %v927_v39  ;;  %v931_v18 = vadd.f32 %v930_v46, %v828_v38  ;;  %v932_v47 = vpop.f32.mrb[15].mxu1  ;;  %v995_v0 = vld [vmem:[%s1604_s30 + $0x28] sm:$0xff] (%p1353_p6)  ;;  %994 = vst [vmem:[%s972_s13 + $0x80] sm:$0xff] (%p1353_p6), %v993_v63 }
 0x3f0   : > { %954 = vst [vmem:[%s1604_s30 + $0x48] sm:$0xff] %v929_v40  ;;  %v933_v49 = vadd.f32 %v932_v47, %v828_v38  ;;  %v997_v1 = vld [vmem:[%s1604_s30 + $0x30] sm:$0xff] (%p1353_p6)  ;;  %996 = vst [vmem:[%s972_s13 + $0x88] sm:$0xff] (%p1353_p6), %v995_v0 }
 0x3f1   : > { %955 = vst [vmem:[%s1604_s30 + $0x50] sm:$0xff] %v931_v18  ;;  %v999_v2 = vld [vmem:[%s1604_s30 + $0x38] sm:$0xff] (%p1353_p6)  ;;  %998 = vst [vmem:[%s972_s13 + $0xc0] sm:$0xff] (%p1353_p6), %v997_v1 }
 0x3f2   : > { %956 = vst [vmem:[%s1604_s30 + $0x58] sm:$0xff] %v933_v49  ;;  %1000 = vst [vmem:[%s972_s13 + $0xc8] sm:$0xff] (%p1353_p6), %v999_v2 }
 0x3f4   : > { %v936_v41 = vpop.f32.mrb[16].mxu1  ;;  %967 = sbr.rel (!%p1353_p6) target bundleno = 1027 (0x403), region = 71 }
 0x3f5   : > { %v937_v50 = vadd.f32 %v936_v41, %v833_v48  ;;  %v938_v42 = vpop.f32.mrb[17].mxu1 }
 0x3f6   : > { %v939_v52 = vadd.f32 %v938_v42, %v833_v48  ;;  %v940_v19 = vpop.f32.mrb[18].mxu1  ;;  %v1001_v3 = vld [vmem:[%s1604_s30 + $0x40] sm:$0xff] (%p1353_p6) }
 0x3f7   : > { %957 = vst [vmem:[%s1604_s30 + $0x60] sm:$0xff] %v937_v50  ;;  %v941_v20 = vadd.f32 %v940_v19, %v838_v51  ;;  %v942_v55 = vpop.f32.mrb[19].mxu1  ;;  %v1003_v27 = vld [vmem:[%s1604_s30 + $0x48] sm:$0xff] (%p1353_p6)  ;;  %1002 = vst [vmem:[%s972_s13 + $0x100] sm:$0xff] (%p1353_p6), %v1001_v3 }
 0x3f8   : > { %958 = vst [vmem:[%s1604_s30 + $0x68] sm:$0xff] %v939_v52  ;;  %v943_v57 = vadd.f32 %v942_v55, %v838_v51  ;;  %v1005_v28 = vld [vmem:[%s1604_s30 + $0x50] sm:$0xff] (%p1353_p6)  ;;  %1004 = vst [vmem:[%s972_s13 + $0x108] sm:$0xff] (%p1353_p6), %v1003_v27 }
 0x3f9   : > { %959 = vst [vmem:[%s1604_s30 + $0x70] sm:$0xff] %v941_v20  ;;  %v1007_v29 = vld [vmem:[%s1604_s30 + $0x58] sm:$0xff] (%p1353_p6)  ;;  %1006 = vst [vmem:[%s972_s13 + $0x140] sm:$0xff] (%p1353_p6), %v1005_v28 }
 0x3fa   : > { %960 = vst [vmem:[%s1604_s30 + $0x78] sm:$0xff] %v943_v57  ;;  %1008 = vst [vmem:[%s972_s13 + $0x148] sm:$0xff] (%p1353_p6), %v1007_v29 }
 0x3fe   : > { %v1009_v30 = vld [vmem:[%s1604_s30 + $0x60] sm:$0xff] }
 0x3ff   : > { %v1011_v31 = vld [vmem:[%s1604_s30 + $0x68] sm:$0xff]  ;;  %1010 = vst [vmem:[%s972_s13 + $0x180] sm:$0xff] %v1009_v30 }
 0x400   : > { %v1013_v34 = vld [vmem:[%s1604_s30 + $0x70] sm:$0xff]  ;;  %1012 = vst [vmem:[%s972_s13 + $0x188] sm:$0xff] %v1011_v31 }
 0x401   : > { %1014 = vst [vmem:[%s972_s13 + $0x1c0] sm:$0xff] %v1013_v34  ;;  %v1015_v4 = vld [vmem:[%s1604_s30 + $0x78] sm:$0xff] }
 0x402   : > { %1016 = vst [vmem:[%s972_s13 + $0x1c8] sm:$0xff] %v1015_v4 }
 0x403 PF: > { %s16_s27 = sadd.s32 1, %s1267_s27   ;;  %s1674_s21 = smov %s1247_s22 }
 0x404   : > { %p13_p12 = scmp.ge.s32.totalorder %s16_s27, 10   ;;  %s1675_s22 = smov %s1361_s12 }
 0x405   : > { %s1676_s23 = smov %s1259_s25  ;;  %s1677_s24 = smov %s1263_s26 }
 0x406   : > { %s1678_s25 = smov %s1681_s28  ;;  %s1679_s26 = smov %s1685_s29 }
 0x407   :  { %15 = sbr.rel (!%p13_p12) target bundleno = 4 (0x4), region = 125 }

</bundles_post_ra>
